<compile_context>
chip_gen: v7x
topology: tpu7x:2x2x1
jax: 0.10.0
libtpu: 0.0.40
codegen_flags: <defaults>
</compile_context>

<pallas_src>
import math

import jax
import jax.numpy as jnp
from jax.experimental import pallas as pl
from jax.experimental.pallas import tpu as pltpu


def _round_up(x, m):
    return (x + m - 1) // m * m


def _pick_tm(m, cap=512):
    """M tile: multiple of 8; >=2 blocks when M allows (v7x has 2 TCs),
    but few enough grid steps to amortize per-step overhead on v5e/v6e."""
    if m <= 8:
        return 8
    tm = _round_up(-(-m // 2), 8)      # two parallel blocks
    return min(tm, cap)


# ----------------------------------------------------------------------------
# Fused decoder kernel: conv3x3 (as matmul over im2col) + bias + ReLU,
# then the 1x1 conv + bias + ReLU fused into the epilogue.  Single store.
# ----------------------------------------------------------------------------
def _decoder_kernel(cols_ref, w1_ref, b1_ref, w2_ref, b2_ref, o_ref):
    # 3x3 conv: (TM, 9*Cin) bf16 @ (9*Cin, mid) bf16 -> f32
    h = jnp.dot(cols_ref[...], w1_ref[...], preferred_element_type=jnp.float32)
    h = jnp.maximum(h + b1_ref[...], 0.0)
    # fused 1x1 conv (commutes with the 2x nearest upsample): bf16 @ bf16 -> f32
    o = jnp.dot(h.astype(jnp.bfloat16), w2_ref[...],
                preferred_element_type=jnp.float32)
    o_ref[...] = jnp.maximum(o + b2_ref[...], 0.0)


# ----------------------------------------------------------------------------
# Parameter init (PyTorch-style uniform) and one-time lane-dense packing.
# ----------------------------------------------------------------------------
def init_decoder_params(key, in_channel, mid_channel, out_channel):
    k1, k2, k3, k4 = jax.random.split(key, 4)

    def conv_init(kw_, kb_, o, i, ks):
        fan_in = i * ks * ks
        bound = 1.0 / math.sqrt(float(fan_in))
        w = jax.random.uniform(kw_, (o, i, ks, ks), jnp.float32, -bound, bound)
        b = jax.random.uniform(kb_, (o,), jnp.float32, -bound, bound)
        return w, b

    w1, b1 = conv_init(k1, k2, mid_channel, in_channel, 3)
    w2, b2 = conv_init(k3, k4, out_channel, mid_channel, 1)
    return {'w1': w1, 'b1': b1, 'w2': w2, 'b2': b2}


def pack_decoder_params(raw, out_pad):
    mid, in_c, kh, kw = raw['w1'].shape
    out_c = raw['w2'].shape[0]
    # conv1: OIHW -> (kh*kw*Cin, mid), row index = (ki*kw + kj)*Cin + c
    w1 = jnp.transpose(raw['w1'], (2, 3, 1, 0)).reshape(kh * kw * in_c, mid)
    w1 = w1.astype(jnp.bfloat16)
    b1 = raw['b1'].astype(jnp.float32).reshape(1, mid)
    # conv2: (out, mid, 1, 1) -> (mid, out_pad) with lane-dense padded columns
    w2 = jnp.transpose(raw['w2'].reshape(out_c, mid), (1, 0))
    w2 = jnp.pad(w2, ((0, 0), (0, out_pad - out_c))).astype(jnp.bfloat16)
    b2 = jnp.pad(raw['b2'], (0, out_pad - out_c)).astype(jnp.float32)
    b2 = b2.reshape(1, out_pad)
    return {'w1': w1, 'b1': b1, 'w2': w2, 'b2': b2}


# ----------------------------------------------------------------------------
# Forward: NCHW in -> NCHW out, one pallas_call for the whole decoder.
# ----------------------------------------------------------------------------
def make_decoder_forward(in_channel, mid_channel, out_channel):
    K = 9 * in_channel
    OUT_PAD = _round_up(out_channel, 128)

    def forward(packed, x_nchw):
        N, _, H, W = x_nchw.shape
        # NCHW -> NHWC once, cast to bf16 once (im2col stays bf16).
        x = jnp.transpose(x_nchw, (0, 2, 3, 1)).astype(jnp.bfloat16)
        # im2col for the 3x3 / pad=1 conv -> (M, 9*Cin) bf16, tap-major columns.
        # TODO(synk): for large H,W move this into the kernel (halo'd LHS
        # blocks / tap grid axis) to avoid the 9x LHS blow-up in HBM.
        xp = jnp.pad(x, ((0, 0), (1, 1), (1, 1), (0, 0)))
        cols = jnp.concatenate(
            [xp[:, i:i + H, j:j + W, :] for i in range(3) for j in range(3)],
            axis=-1).reshape(N * H * W, K)

        M = N * H * W
        TM = _pick_tm(M)
        Mp = _round_up(M, TM)
        if Mp != M:
            cols = jnp.pad(cols, ((0, Mp - M), (0, 0)))

        out = pl.pallas_call(
            _decoder_kernel,
            out_shape=jax.ShapeDtypeStruct((Mp, OUT_PAD), jnp.float32),
            grid_spec=pltpu.PrefetchScalarGridSpec(
                num_scalar_prefetch=0,
                grid=(Mp // TM,),
                in_specs=[
                    pl.BlockSpec((TM, K), lambda i: (i, 0)),
                    pl.BlockSpec((K, mid_channel), lambda i: (0, 0)),
                    pl.BlockSpec((1, mid_channel), lambda i: (0, 0)),
                    pl.BlockSpec((mid_channel, OUT_PAD), lambda i: (0, 0)),
                    pl.BlockSpec((1, OUT_PAD), lambda i: (0, 0)),
                ],
                out_specs=pl.BlockSpec((TM, OUT_PAD), lambda i: (i, 0)),
            ),
            compiler_params=pltpu.CompilerParams(
                dimension_semantics=("parallel",)),
            cost_estimate=pl.CostEstimate(
                flops=2 * Mp * K * mid_channel
                      + 2 * Mp * mid_channel * OUT_PAD,
                transcendentals=0,
                bytes_accessed=(Mp * K + K * mid_channel
                                + mid_channel * OUT_PAD) * 2
                               + Mp * OUT_PAD * 4),
        )(cols, packed['w1'], packed['b1'], packed['w2'], packed['b2'])

        # Slice + NHWC->NCHW on the small (pre-upsample) tensor, then a single
        # broadcast+reshape 2x nearest-neighbor upsample (one pass).
        y = out[:M, :out_channel].reshape(N, H, W, out_channel)
        y = jnp.transpose(y, (0, 3, 1, 2))                  # (N, out_c, H, W)
        y = jnp.broadcast_to(y[:, :, :, None, :, None],
                             (N, out_channel, H, 2, W, 2))
        return y.reshape(N, out_channel, 2 * H, 2 * W)

    return forward


# ----------------------------------------------------------------------------
# Pure-XLA f32 reference (PyTorch forward semantics) for a tolerance check.
# ----------------------------------------------------------------------------
def _reference_decoder(raw, x):
    dn = ('NCHW', 'OIHW', 'NCHW')
    y = jax.lax.conv_general_dilated(x, raw['w1'], (1, 1), ((1, 1), (1, 1)),
                                     dimension_numbers=dn)
    y = jnp.maximum(y + raw['b1'][None, :, None, None], 0.0)
    y = jnp.repeat(jnp.repeat(y, 2, axis=2), 2, axis=3)     # nearest 2x
    y = jnp.maximum(y, 0.0)
    y = jax.lax.conv_general_dilated(y, raw['w2'], (1, 1), 'VALID',
                                     dimension_numbers=dn)
    return jnp.maximum(y + raw['b2'][None, :, None, None], 0.0)


if __name__ == "__main__":
    key = jax.random.PRNGKey(0)
    kp, kx = jax.random.split(key)

    in_c, mid_c, out_c = 64, 32, 32
    N, H, W = 2, 16, 16
    x = jax.random.normal(kx, (N, in_c, H, W), jnp.float32)

    raw = init_decoder_params(kp, in_c, mid_c, out_c)
    packed = pack_decoder_params(raw, out_pad=_round_up(out_c, 128))
    forward = jax.jit(make_decoder_forward(in_c, mid_c, out_c))

    y = forward(packed, x)
    jax.block_until_ready(y)

    assert y.shape == (N, out_c, 2 * H, 2 * W)
    assert bool(jnp.all(jnp.isfinite(y)))
    assert bool(jnp.all(y >= 0.0))        # final ReLU

    # bf16 MXU operands (f32 accumulation) => loose tolerance vs f32 reference.
    y_ref = _reference_decoder(raw, x)
    max_err = float(jnp.max(jnp.abs(y - y_ref)))
    assert max_err < 7.5e-2, f"max abs err {max_err}"

    print("KERNEL_OK")
</pallas_src>

<mosaic_0001>
module attributes {stable_mosaic.version = 11 : i64} {
  func.func @_decoder_kernel(%arg0: i32, %arg1: memref<256x576xbf16, #tpu.memory_space<vmem>>, %arg2: memref<576x32xbf16, #tpu.memory_space<vmem>>, %arg3: memref<1x32xf32, #tpu.memory_space<vmem>>, %arg4: memref<32x128xbf16, #tpu.memory_space<vmem>>, %arg5: memref<1x128xf32, #tpu.memory_space<vmem>>, %arg6: memref<256x128xf32, #tpu.memory_space<vmem>>) attributes {dimension_semantics = [#tpu.dimension_semantics<parallel>], iteration_bounds = array<i64: 2>, scalar_prefetch = 0 : i64, scratch_operands = 0 : i64, tpu.core_type = #tpu.core_type<tc>, window_params = [{transform_indices = @transform_0, window_bounds = array<i64: 256, 576>}, {pipeline_mode = #tpu.pipeline_mode<synchronous>, transform_indices = @transform_1, window_bounds = array<i64: 576, 32>}, {pipeline_mode = #tpu.pipeline_mode<synchronous>, transform_indices = @transform_2, window_bounds = array<i64: 1, 32>}, {pipeline_mode = #tpu.pipeline_mode<synchronous>, transform_indices = @transform_3, window_bounds = array<i64: 32, 128>}, {pipeline_mode = #tpu.pipeline_mode<synchronous>, transform_indices = @transform_4, window_bounds = array<i64: 1, 128>}, {transform_indices = @transform_5, window_bounds = array<i64: 256, 128>}]} {
    %c0 = arith.constant 0 : index
    %c0_0 = arith.constant 0 : index
    %0 = vector.load %arg1[%c0, %c0_0] : memref<256x576xbf16, #tpu.memory_space<vmem>>, vector<256x576xbf16>
    %c0_1 = arith.constant 0 : index
    %c0_2 = arith.constant 0 : index
    %1 = vector.load %arg2[%c0_1, %c0_2] : memref<576x32xbf16, #tpu.memory_space<vmem>>, vector<576x32xbf16>
    %cst = arith.constant dense<0.000000e+00> : vector<256x32xf32>
    %2 = tpu.matmul %0, %1, %cst {dimension_numbers = #tpu.dot_dimension_numbers<[1], [0], [0], [1], [0, 0, 1, 1], [], []>} : vector<256x576xbf16>, vector<576x32xbf16>, vector<256x32xf32> -> vector<256x32xf32>
    %c0_3 = arith.constant 0 : index
    %c0_4 = arith.constant 0 : index
    %3 = vector.load %arg3[%c0_3, %c0_4] : memref<1x32xf32, #tpu.memory_space<vmem>>, vector<1x32xf32>
    %4 = vector.broadcast %3 : vector<1x32xf32> to vector<256x32xf32>
    %5 = arith.addf %2, %4 : vector<256x32xf32>
    %cst_5 = arith.constant 0.000000e+00 : f32
    %6 = vector.broadcast %cst_5 : f32 to vector<256x32xf32>
    %7 = arith.maximumf %5, %6 : vector<256x32xf32>
    %8 = arith.truncf %7 : vector<256x32xf32> to vector<256x32xbf16>
    %c0_6 = arith.constant 0 : index
    %c0_7 = arith.constant 0 : index
    %9 = vector.load %arg4[%c0_6, %c0_7] : memref<32x128xbf16, #tpu.memory_space<vmem>>, vector<32x128xbf16>
    %cst_8 = arith.constant dense<0.000000e+00> : vector<256x128xf32>
    %10 = tpu.matmul %8, %9, %cst_8 {dimension_numbers = #tpu.dot_dimension_numbers<[1], [0], [0], [1], [0, 0, 1, 1], [], []>} : vector<256x32xbf16>, vector<32x128xbf16>, vector<256x128xf32> -> vector<256x128xf32>
    %c0_9 = arith.constant 0 : index
    %c0_10 = arith.constant 0 : index
    %11 = vector.load %arg5[%c0_9, %c0_10] : memref<1x128xf32, #tpu.memory_space<vmem>>, vector<1x128xf32>
    %12 = vector.broadcast %11 : vector<1x128xf32> to vector<256x128xf32>
    %13 = arith.addf %10, %12 : vector<256x128xf32>
    %cst_11 = arith.constant 0.000000e+00 : f32
    %14 = vector.broadcast %cst_11 : f32 to vector<256x128xf32>
    %15 = arith.maximumf %13, %14 : vector<256x128xf32>
    %c0_12 = arith.constant 0 : index
    %c0_13 = arith.constant 0 : index
    %16 = vector.load %arg6[%c0_12, %c0_13] : memref<256x128xf32, #tpu.memory_space<vmem>>, vector<256x128xf32>
    tpu.vector_store %arg6[%c0_12, %c0_13], %15 {strides = array<i32>} : memref<256x128xf32, #tpu.memory_space<vmem>>, vector<256x128xf32>,
    return
  }
  func.func @transform_0(%arg0: i32) -> (i32, i32) {
    %c0_i32 = arith.constant 0 : i32
    %c0_i32_0 = arith.constant 0 : i32
    return %arg0, %c0_i32 : i32, i32
  }
  func.func @transform_1(%arg0: i32) -> (i32, i32) {
    %c0_i32 = arith.constant 0 : i32
    %c0_i32_0 = arith.constant 0 : i32
    %c0_i32_1 = arith.constant 0 : i32
    return %c0_i32, %c0_i32_0 : i32, i32
  }
  func.func @transform_2(%arg0: i32) -> (i32, i32) {
    %c0_i32 = arith.constant 0 : i32
    %c0_i32_0 = arith.constant 0 : i32
    %c0_i32_1 = arith.constant 0 : i32
    return %c0_i32, %c0_i32_0 : i32, i32
  }
  func.func @transform_3(%arg0: i32) -> (i32, i32) {
    %c0_i32 = arith.constant 0 : i32
    %c0_i32_0 = arith.constant 0 : i32
    %c0_i32_1 = arith.constant 0 : i32
    return %c0_i32, %c0_i32_0 : i32, i32
  }
  func.func @transform_4(%arg0: i32) -> (i32, i32) {
    %c0_i32 = arith.constant 0 : i32
    %c0_i32_0 = arith.constant 0 : i32
    %c0_i32_1 = arith.constant 0 : i32
    return %c0_i32, %c0_i32_0 : i32, i32
  }
  func.func @transform_5(%arg0: i32) -> (i32, i32) {
    %c0_i32 = arith.constant 0 : i32
    %c0_i32_0 = arith.constant 0 : i32
    return %arg0, %c0_i32 : i32, i32
  }
}

</mosaic_0001>

<bundles_post_ra>
// kernel: forward.1
= control target key start
LH: loop header
LB: loop body
LE: loop exit
PB: predicated region body
PF: predicated region fallthrough
CT: control target
= control target key end

     0   :  { %s2654_s18 = smov 0   ;;  %s3109_s0 = inlined_call_operand.vmem [shape: bf16[512,576], index: 0, kind: input, shape index: {}]   ;;  %s3110_s1 = inlined_call_operand.vmem [shape: bf16[576,32], index: 1, kind: input, shape index: {}]   ;;  %s3111_s2 = inlined_call_operand.vmem [shape: f32[1,32], index: 2, kind: input, shape index: {}]   ;;  %s3112_s3 = inlined_call_operand.vmem [shape: bf16[32,128], index: 3, kind: input, shape index: {}]   ;;  %s3113_s4 = inlined_call_operand.vmem [shape: f32[1,128], index: 4, kind: input, shape index: {}]   ;;  %s3114_s5 = inlined_call_operand.vmem [shape: f32[512,128], index: 5, kind: output, shape index: {}]  }
   0x1 LB: > { %s1956_s19 = sadd.s32 4294967295, %s2622_s18   ;;  %p1960_p0 = scmp.ge.s32.totalorder %s2622_s18, 1  ;;  %s2622_s18 = sphi %s2654_s18, %s15_s18  }
   0x2   : > { %p189_p1 = scmp.lt.s32.totalorder %s2622_s18, 3 }
   0x4   : > { %p190_p2 = pnand %p1960_p0, %p189_p1 }
   0x5   : > { %v2466_v0 = vld [vmem:[%s3110_s1 + $0x40] sm:$0xff] (!%p190_p2)   ;;  %v2470_v4 = vld [vmem:[%s3110_s1 + $0x48] sm:$0xff] (!%p190_p2)   ;;  %v2474_v8 = vld [vmem:[%s3110_s1 + $0x50] sm:$0xff] (!%p190_p2)   ;;  %s1961_s25 = sshll.u32 (!%p190_p2), %s1956_s19, 5  ;;  %vm1023_vm0 = vcmask (!%p190_p2), 523264   ;;  %vm1626_vm1 = vcmask (!%p190_p2), 261120  }
   0x6   : > { %193 = sbr.rel (%p190_p2) target bundleno = 664 (0x298), region = 40  ;;  %v2467_v1 = vld [vmem:[%s3110_s1] sm:$0xff] (!%p190_p2)   ;;  %2119 = vmatprep.subr.bf16.mxu0 (!%p190_p2), %v2466_v0  ;;  %v2471_v5 = vld [vmem:[%s3110_s1 + $0x8] sm:$0xff] (!%p190_p2)   ;;  %v2475_v9 = vld [vmem:[%s3110_s1 + $0x10] sm:$0xff] (!%p190_p2)   ;;  %p219_p3 = scmp.lt.s32.totalorder (!%p190_p2), %s1961_s25, 63 }
   0x7   : > { %v2468_v2 = vld [vmem:[%s3110_s1 + $0xc0] sm:$0xff] (!%p190_p2)   ;;  %2120 = vmatpush3.bf16.msra.mxu0 (!%p190_p2), %v2467_v1  ;;  %v2472_v6 = vld [vmem:[%s3110_s1 + $0xc8] sm:$0xff] (!%p190_p2)   ;;  %v2476_v10 = vld [vmem:[%s3110_s1 + $0xd0] sm:$0xff] (!%p190_p2)  }
   0x8   : > { %v2469_v3 = vld [vmem:[%s3110_s1 + $0x80] sm:$0xff] (!%p190_p2)   ;;  %2231 = vmatprep.subr.bf16.mxu1 (!%p190_p2), %v2468_v2  ;;  %2121 = vmatprep.subr.bf16.mxu0 (!%p190_p2), %v2470_v4  ;;  %v2473_v7 = vld [vmem:[%s3110_s1 + $0x88] sm:$0xff] (!%p190_p2)   ;;  %v2477_v11 = vld [vmem:[%s3110_s1 + $0x90] sm:$0xff] (!%p190_p2)  }
   0x9   : > { %2232 = vmatpush3.bf16.msra.mxu1 (!%p190_p2), %v2469_v3  ;;  %v2478_v12 = vld [vmem:[%s3110_s1 + $0x58] sm:$0xff] (!%p190_p2)   ;;  %v2482_v16 = vld [vmem:[%s3110_s1 + $0x60] sm:$0xff] (!%p190_p2)   ;;  %v2486_v20 = vld [vmem:[%s3110_s1 + $0x68] sm:$0xff] (!%p190_p2)  }
   0xa   : > { %2233 = vmatprep.subr.bf16.mxu1 (!%p190_p2), %v2472_v6  ;;  %v2479_v13 = vld [vmem:[%s3110_s1 + $0x18] sm:$0xff] (!%p190_p2)   ;;  %v2483_v17 = vld [vmem:[%s3110_s1 + $0x20] sm:$0xff] (!%p190_p2)   ;;  %v2487_v21 = vld [vmem:[%s3110_s1 + $0x28] sm:$0xff] (!%p190_p2)  }
   0xb   : > { %2122 = vmatpush3.bf16.msra.mxu0 (!%p190_p2), %v2471_v5  ;;  %v2480_v14 = vld [vmem:[%s3110_s1 + $0xd8] sm:$0xff] (!%p190_p2)   ;;  %v2484_v18 = vld [vmem:[%s3110_s1 + $0xe0] sm:$0xff] (!%p190_p2)   ;;  %v2488_v22 = vld [vmem:[%s3110_s1 + $0xe8] sm:$0xff] (!%p190_p2)  }
   0xc   : > { %2123 = vmatprep.subr.bf16.mxu0 (!%p190_p2), %v2474_v8  ;;  %v2481_v15 = vld [vmem:[%s3110_s1 + $0x98] sm:$0xff] (!%p190_p2)   ;;  %v2485_v19 = vld [vmem:[%s3110_s1 + $0xa0] sm:$0xff] (!%p190_p2)   ;;  %v2489_v23 = vld [vmem:[%s3110_s1 + $0xa8] sm:$0xff] (!%p190_p2)  }
   0xd   : > { %2234 = vmatpush3.bf16.msra.mxu1 %v2473_v7  ;;  %s3116_s25 = smov (!%p219_p3, %s1961_s25), 63  ;;  %v2490_v24 = vld [vmem:[%s3110_s1 + $0x70] sm:$0xff]   ;;  %v2494_v28 = vld [vmem:[%s3110_s1 + $0x78] sm:$0xff]   ;;  %v2501_v34 = vld [vmem:[%s3110_s1 + $0x100] sm:$0xff]  }
   0xe   : > { %2235 = vmatprep.subr.bf16.mxu1 %v2476_v10  ;;  %s2457_s24 = smul.u32 20, %s3116_s25  ;;  %v2491_v25 = vld [vmem:[%s3110_s1 + $0x30] sm:$0xff]   ;;  %v2495_v29 = vld [vmem:[%s3110_s1 + $0x38] sm:$0xff]   ;;  %v2526_v43 = vld [vmem:[%s3110_s1 + $0x108] sm:$0xff]  }
   0xf   : > { %2124 = vmatpush3.bf16.msra.mxu0 %v2475_v9  ;;  %v2492_v26 = vld [vmem:[%s3110_s1 + $0xf0] sm:$0xff]   ;;  %v2496_v30 = vld [vmem:[%s3110_s1 + $0xf8] sm:$0xff]  }
  0x10   : > { %2125 = vmatprep.subr.bf16.mxu0 %v2478_v12  ;;  %v2493_v27 = vld [vmem:[%s3110_s1 + $0xb0] sm:$0xff]   ;;  %s2757_s10 = scalar_lea.vmem %s3109_s0, %s2457_s24  ;;  %v2500_v33 = vld [vmem:[%s3110_s1 + $0xb8] sm:$0xff]  }
  0x11   : > { %2236 = vmatpush3.bf16.msra.mxu1 %v2477_v11  ;;  %v2497_v31 = vld [vmem:[%s2757_s10] ss:$20 sps:$4 sm:$0xff]   ;;  %v2499_v32 = vld [vmem:[%s2757_s10 + $0x4] ss:$20 sps:$4 sm:$0xff]   ;;  %v2502_v35 = vld [vmem:[%s2757_s10 + $0x8] ss:$20 sps:$4 sm:$0xff]  }
  0x12   : > { %2237 = vmatprep.subr.bf16.mxu1 %v2480_v14  ;;  %1104 = vmatprep.mubr.bf16.mxu0 %v2499_v32  ;;  %v2504_v36 = vld [vmem:[%s2757_s10 + $0xc] ss:$20 sps:$4 sm:$0xff]   ;;  %v2508_v38 = vld [vmem:[%s2757_s10 + $0x34] ss:$20 sps:$4 sm:$0xff]   ;;  %v2510_v41 = vld [vmem:[%s2757_s10 + $0x30] ss:$20 sps:$4 sm:$0xff]  }
  0x13   : > { %2126 = vmatpush3.bf16.msra.mxu0 %v2479_v13  ;;  %v2505_v37 = vld [vmem:[%s2757_s10 + $0x2c] ss:$20 sps:$4 sm:$0xff]   ;;  %1265 = vmatprep.mubr.bf16.mxu1 %v2504_v36  ;;  %v2507_v39 = vld [vmem:[%s2757_s10 + $0x28] ss:$20 sps:$4 sm:$0xff]   ;;  %v2513_v44 = vld [vmem:[%s2757_s10 + $0x50] ss:$20 sps:$4 sm:$0xff]  }
  0x14   : > { %2127 = vmatprep.subr.bf16.mxu0 %v2482_v16  ;;  %v2511_v40 = vld [vmem:[%s2757_s10 + $0x54] ss:$20 sps:$4 sm:$0xff]   ;;  %v2514_v42 = vld [vmem:[%s2757_s10 + $0x5c] ss:$20 sps:$4 sm:$0xff]   ;;  %v2516_v46 = vld [vmem:[%s2757_s10 + $0x58] ss:$20 sps:$4 sm:$0xff]  }
  0x15   : > { %2238 = vmatpush3.bf16.msra.mxu1 %v2481_v15  ;;  %v2517_v45 = vld [vmem:[%s2757_s10 + $0x7c] ss:$20 sps:$4 sm:$0xff]   ;;  %v2520_v47 = vld [vmem:[%s2757_s10 + $0x84] ss:$20 sps:$4 sm:$0xff]   ;;  %v2522_v51 = vld [vmem:[%s2757_s10 + $0x80] ss:$20 sps:$4 sm:$0xff]  }
  0x16   : > { %2239 = vmatprep.subr.bf16.mxu1 %v2484_v18  ;;  %v2519_v48 = vld [vmem:[%s2757_s10 + $0x78] ss:$20 sps:$4 sm:$0xff]   ;;  %v2551_v50 = vld [vmem:[%s3110_s1 + $0x110] sm:$0xff]   ;;  %v2529_v55 = vld [vmem:[%s2757_s10 + $0xa8] ss:$20 sps:$4 sm:$0xff]  }
  0x17   : > { %2128 = vmatpush3.bf16.msra.mxu0 %v2483_v17  ;;  %v2523_v49 = vld [vmem:[%s2757_s10 + $0xa4] ss:$20 sps:$4 sm:$0xff]   ;;  %v2527_v52 = vld [vmem:[%s2757_s10 + $0xac] ss:$20 sps:$4 sm:$0xff]   ;;  %v2533_v56 = vld [vmem:[%s2757_s10 + $0xd4] ss:$20 sps:$4 sm:$0xff]  }
  0x18   : > { %2129 = vmatprep.subr.bf16.mxu0 %v2486_v20  ;;  %v2525_v53 = vld [vmem:[%s2757_s10 + $0xa0] ss:$20 sps:$4 sm:$0xff]   ;;  %v2576_v57 = vld [vmem:[%s3110_s1 + $0x118] sm:$0xff]   ;;  %v2535_v60 = vld [vmem:[%s2757_s10 + $0xd0] ss:$20 sps:$4 sm:$0xff]  }
  0x19   : > { %2240 = vmatpush3.bf16.msra.mxu1 %v2485_v19  ;;  %v2530_v54 = vld [vmem:[%s2757_s10 + $0xcc] ss:$20 sps:$4 sm:$0xff]   ;;  %v2532_v58 = vld [vmem:[%s2757_s10 + $0xc8] ss:$20 sps:$4 sm:$0xff]   ;;  %v2538_v62 = vld [vmem:[%s2757_s10 + $0xf0] ss:$20 sps:$4 sm:$0xff]  }
  0x1a   : > { %2241 = vmatprep.subr.bf16.mxu1 %v2488_v22  ;;  %v2536_v59 = vld [vmem:[%s2757_s10 + $0xf4] ss:$20 sps:$4 sm:$0xff]   ;;  %v2539_v61 = vld [vmem:[%s2757_s10 + $0xfc] ss:$20 sps:$4 sm:$0xff]   ;;  %v2541_v0 = vld [vmem:[%s2757_s10 + $0xf8] ss:$20 sps:$4 sm:$0xff]  }
  0x1b   : > { %2130 = vmatpush3.bf16.msra.mxu0 %v2487_v21  ;;  %v2542_v63 = vld [vmem:[%s2757_s10 + $0x11c] ss:$20 sps:$4 sm:$0xff]   ;;  %v2545_v1 = vld [vmem:[%s2757_s10 + $0x124] ss:$20 sps:$4 sm:$0xff]   ;;  %v2547_v4 = vld [vmem:[%s2757_s10 + $0x120] ss:$20 sps:$4 sm:$0xff]  }
  0x1c   : > { %2131 = vmatprep.subr.bf16.mxu0 %v2490_v24  ;;  %v2544_v2 = vld [vmem:[%s2757_s10 + $0x118] ss:$20 sps:$4 sm:$0xff]   ;;  %v2550_v6 = vld [vmem:[%s2757_s10 + $0x140] ss:$20 sps:$4 sm:$0xff]   ;;  %v2554_v8 = vld [vmem:[%s2757_s10 + $0x148] ss:$20 sps:$4 sm:$0xff]  }
  0x1d   : > { %2242 = vmatpush3.bf16.msra.mxu1 %v2489_v23  ;;  %v2548_v3 = vld [vmem:[%s2757_s10 + $0x144] ss:$20 sps:$4 sm:$0xff]   ;;  %v2552_v5 = vld [vmem:[%s2757_s10 + $0x14c] ss:$20 sps:$4 sm:$0xff]   ;;  %v2558_v9 = vld [vmem:[%s2757_s10 + $0x174] ss:$20 sps:$4 sm:$0xff]  }
  0x1e   : > { %2243 = vmatprep.subr.bf16.mxu1 %v2492_v26  ;;  %v2555_v7 = vld [vmem:[%s2757_s10 + $0x16c] ss:$20 sps:$4 sm:$0xff]   ;;  %v2557_v10 = vld [vmem:[%s2757_s10 + $0x168] ss:$20 sps:$4 sm:$0xff]   ;;  %v2560_v12 = vld [vmem:[%s2757_s10 + $0x170] ss:$20 sps:$4 sm:$0xff]  }
  0x1f   : > { %2132 = vmatpush3.bf16.msra.mxu0 %v2491_v25  ;;  %v2561_v11 = vld [vmem:[%s2757_s10 + $0x194] ss:$20 sps:$4 sm:$0xff]   ;;  %v2564_v13 = vld [vmem:[%s2757_s10 + $0x19c] ss:$20 sps:$4 sm:$0xff]   ;;  %v2566_v16 = vld [vmem:[%s2757_s10 + $0x198] ss:$20 sps:$4 sm:$0xff]  }
  0x20   : > { %2133 = vmatprep.subr.bf16.mxu0 %v2494_v28  ;;  %v2563_v14 = vld [vmem:[%s2757_s10 + $0x190] ss:$20 sps:$4 sm:$0xff]   ;;  %v2569_v18 = vld [vmem:[%s2757_s10 + $0x1b8] ss:$20 sps:$4 sm:$0xff]   ;;  %v2572_v20 = vld [vmem:[%s2757_s10 + $0x1c0] ss:$20 sps:$4 sm:$0xff]  }
  0x21   : > { %2244 = vmatpush3.bf16.msra.mxu1 %v2493_v27  ;;  %v2567_v15 = vld [vmem:[%s2757_s10 + $0x1bc] ss:$20 sps:$4 sm:$0xff]   ;;  %v2570_v17 = vld [vmem:[%s2757_s10 + $0x1c4] ss:$20 sps:$4 sm:$0xff]   ;;  %v2577_v21 = vld [vmem:[%s2757_s10 + $0x1ec] ss:$20 sps:$4 sm:$0xff]  }
  0x22   : > { %2245 = vmatprep.subr.bf16.mxu1 %v2496_v30  ;;  %v2573_v19 = vld [vmem:[%s2757_s10 + $0x1e4] ss:$20 sps:$4 sm:$0xff]   ;;  %v2575_v22 = vld [vmem:[%s2757_s10 + $0x1e0] ss:$20 sps:$4 sm:$0xff]   ;;  %v2579_v24 = vld [vmem:[%s2757_s10 + $0x1e8] ss:$20 sps:$4 sm:$0xff]  }
  0x23   : > { %2134 = vmatpush3.bf16.msra.mxu0 %v2495_v29  ;;  %v2580_v23 = vld [vmem:[%s2757_s10 + $0x20c] ss:$20 sps:$4 sm:$0xff]   ;;  %v2583_v25 = vld [vmem:[%s2757_s10 + $0x214] ss:$20 sps:$4 sm:$0xff]   ;;  %v2585_v29 = vld [vmem:[%s2757_s10 + $0x210] ss:$20 sps:$4 sm:$0xff]  }
  0x24   : > { %2381 = vmatprep.subr.bf16.mxu0 %v2501_v34  ;;  %v2614_v26 = vld [vmem:[%s3112_s3] sm:$0xff]   ;;  %v2582_v27 = vld [vmem:[%s2757_s10 + $0x208] ss:$20 sps:$4 sm:$0xff]  }
  0x25   : > { %2246 = vmatpush3.bf16.msra.mxu1 %v2500_v33  ;;  %v2586_v28 = vld [vmem:[%s2757_s10 + $0x234] ss:$20 sps:$4 sm:$0xff]   ;;  %v2589_v30 = vld [vmem:[%s2757_s10 + $0x23c] ss:$20 sps:$4 sm:$0xff]   ;;  %v2591_v33 = vld [vmem:[%s2757_s10 + $0x238] ss:$20 sps:$4 sm:$0xff]  }
  0x26   : > { %1105 = vmatmul.mubr.bf16.vlgmr.msra.gmra.mrb[0].mxu0 %v2497_v31  ;;  %2421 = vmatprep.subr.bf16.mxu1 %v2614_v26  ;;  %v2588_v31 = vld [vmem:[%s2757_s10 + $0x230] ss:$20 sps:$4 sm:$0xff]  }
  0x27   : > { %2382 = vmatpush3.bf16.msra.mxu0 %v2501_v34  ;;  %1112 = vmatprep.mubr.bf16.mxu0 %v2505_v37  ;;  %v2592_v32 = vld [vmem:[%s2757_s10 + $0x25c] ss:$20 sps:$4 sm:$0xff]   ;;  %v2595_v34 = vld [vmem:[%s2757_s10 + $0x264] ss:$20 sps:$4 sm:$0xff]   ;;  %v2597_v37 = vld [vmem:[%s2757_s10 + $0x260] ss:$20 sps:$4 sm:$0xff]  }
  0x28   : > { %1266 = vmatmul.mubr.bf16.vlgmr.msra.gmra.mrb[0].mxu1 %v2502_v35  ;;  %2383 = vmatprep.subr.bf16.mxu0 %v2526_v43  ;;  %v2594_v35 = vld [vmem:[%s2757_s10 + $0x258] ss:$20 sps:$4 sm:$0xff]   ;;  %v2598_v36 = vld [vmem:[%s2757_s10 + $0x10] ss:$20 sps:$4 sm:$0xff]  }
  0x29   : > { %1273 = vmatprep.mubr.bf16.mxu1 %v2508_v38  ;;  %2422 = vmatpush3.bf16.msra.mxu1 %v2614_v26  ;;  %v2599_v38 = vld [vmem:[%s2757_s10 + $0x38] ss:$20 sps:$4 sm:$0xff]  }
  0x2b   : > { %2384 = vmatpush3.bf16.msra.mxu0 %v2526_v43  ;;  %v2604_v43 = vld [vmem:[%s2757_s10 + $0x100] ss:$20 sps:$4 sm:$0xff]  }
  0x2c   : > { %2385 = vmatprep.subr.bf16.mxu0 %v2551_v50 }
  0x2e   : > { %1113 = vmatmul.mubr.bf16.gmra.mrb[4].mxu0 %v2507_v39  ;;  %v2600_v39 = vld [vmem:[%s2757_s10 + $0x60] ss:$20 sps:$4 sm:$0xff]  }
  0x2f   : > { %1120 = vmatprep.mubr.bf16.mxu0 %v2511_v40  ;;  %2386 = vmatpush3.bf16.msra.mxu0 %v2551_v50  ;;  %v2601_v40 = vld [vmem:[%s2757_s10 + $0x88] ss:$20 sps:$4 sm:$0xff]   ;;  %v2610_v50 = vld [vmem:[%s2757_s10 + $0x1f0] ss:$20 sps:$4 sm:$0xff]  }
  0x30   : > { %1274 = vmatmul.mubr.bf16.gmra.mrb[4].mxu1 %v2510_v41  ;;  %2387 = vmatprep.subr.bf16.mxu0 %v2576_v57  ;;  %v2602_v41 = vld [vmem:[%s2757_s10 + $0xb0] ss:$20 sps:$4 sm:$0xff]  }
  0x31   : > { %1281 = vmatprep.mubr.bf16.mxu1 %v2514_v42  ;;  %v2603_v42 = vld [vmem:[%s2757_s10 + $0xd8] ss:$20 sps:$4 sm:$0xff]  }
  0x33   : > { %2388 = vmatpush3.bf16.msra.mxu0 %v2576_v57 }
  0x36   : > { %1121 = vmatmul.mubr.bf16.gmra.mrb[8].mxu0 %v2513_v44  ;;  %v2605_v44 = vld [vmem:[%s2757_s10 + $0x128] ss:$20 sps:$4 sm:$0xff]  }
  0x37   : > { %1128 = vmatprep.mubr.bf16.mxu0 %v2517_v45  ;;  %v2606_v45 = vld [vmem:[%s2757_s10 + $0x150] ss:$20 sps:$4 sm:$0xff]  }
  0x38   : > { %1282 = vmatmul.mubr.bf16.gmra.mrb[8].mxu1 %v2516_v46  ;;  %v2607_v46 = vld [vmem:[%s2757_s10 + $0x178] ss:$20 sps:$4 sm:$0xff]  }
  0x39   : > { %1289 = vmatprep.mubr.bf16.mxu1 %v2520_v47  ;;  %v2608_v47 = vld [vmem:[%s2757_s10 + $0x1a0] ss:$20 sps:$4 sm:$0xff]  }
  0x3e   : > { %1129 = vmatmul.mubr.bf16.gmra.mrb[12].mxu0 %v2519_v48  ;;  %v2615_v48 = vld [vmem:[%s3112_s3 + $0x8] sm:$0xff]  }
  0x3f   : > { %1136 = vmatprep.mubr.bf16.mxu0 %v2523_v49  ;;  %2423 = vmatprep.subr.bf16.mxu1 %v2615_v48  ;;  %v2609_v49 = vld [vmem:[%s2757_s10 + $0x1c8] ss:$20 sps:$4 sm:$0xff]  }
  0x40   : > { %1290 = vmatmul.mubr.bf16.gmra.mrb[12].mxu1 %v2522_v51  ;;  %v2611_v51 = vld [vmem:[%s2757_s10 + $0x218] ss:$20 sps:$4 sm:$0xff]  }
  0x41   : > { %1297 = vmatprep.mubr.bf16.mxu1 %v2527_v52  ;;  %2424 = vmatpush3.bf16.msra.mxu1 %v2615_v48  ;;  %v2612_v52 = vld [vmem:[%s2757_s10 + $0x240] ss:$20 sps:$4 sm:$0xff]  }
  0x46   : > { %1137 = vmatmul.mubr.bf16.gmra.mrb[16].mxu0 %v2525_v53  ;;  %v2613_v53 = vld [vmem:[%s2757_s10 + $0x268] ss:$20 sps:$4 sm:$0xff]   ;;  %s1964_s10 = sshll.u32 %s3116_s25, 3 }
  0x47   : > { %1144 = vmatprep.mubr.bf16.mxu0 %v2530_v54  ;;  %s3041_s13 = scalar_lea.vmem %s3114_s5, %s1964_s10 }
  0x48   : > { %1298 = vmatmul.mubr.bf16.gmra.mrb[16].mxu1 %v2529_v55  ;;  %v2885_v55 = vld [vmem:[%s3111_s2] ss:$0 sm:$0xff] }
  0x49   : > { %1305 = vmatprep.mubr.bf16.mxu1 %v2533_v56 }
  0x4e   : > { %1145 = vmatmul.mubr.bf16.gmra.mrb[20].mxu0 %v2532_v58 }
  0x4f   : > { %1152 = vmatprep.mubr.bf16.mxu0 %v2536_v59 }
  0x50   : > { %1306 = vmatmul.mubr.bf16.gmra.mrb[20].mxu1 %v2535_v60 }
  0x51   : > { %1313 = vmatprep.mubr.bf16.mxu1 %v2539_v61 }
  0x56   : > { %1153 = vmatmul.mubr.bf16.gmra.mrb[24].mxu0 %v2538_v62 }
  0x57   : > { %1160 = vmatprep.mubr.bf16.mxu0 %v2542_v63 }
  0x58   : > { %1314 = vmatmul.mubr.bf16.gmra.mrb[24].mxu1 %v2541_v0 }
  0x59   : > { %1321 = vmatprep.mubr.bf16.mxu1 %v2545_v1 }
  0x5e   : > { %1161 = vmatmul.mubr.bf16.gmra.mrb[28].mxu0 %v2544_v2 }
  0x5f   : > { %1168 = vmatprep.mubr.bf16.mxu0 %v2548_v3 }
  0x60   : > { %1322 = vmatmul.mubr.bf16.gmra.mrb[28].mxu1 %v2547_v4 }
  0x61   : > { %1329 = vmatprep.mubr.bf16.mxu1 %v2552_v5 }
  0x66   : > { %1169 = vmatmul.mubr.bf16.gmra.mrb[32].mxu0 %v2550_v6 }
  0x67   : > { %1176 = vmatprep.mubr.bf16.mxu0 %v2555_v7 }
  0x68   : > { %1330 = vmatmul.mubr.bf16.gmra.mrb[32].mxu1 %v2554_v8 }
  0x69   : > { %1337 = vmatprep.mubr.bf16.mxu1 %v2558_v9 }
  0x6e   : > { %1177 = vmatmul.mubr.bf16.gmra.mrb[36].mxu0 %v2557_v10 }
  0x6f   : > { %1184 = vmatprep.mubr.bf16.mxu0 %v2561_v11 }
  0x70   : > { %1338 = vmatmul.mubr.bf16.gmra.mrb[36].mxu1 %v2560_v12 }
  0x71   : > { %1345 = vmatprep.mubr.bf16.mxu1 %v2564_v13 }
  0x76   : > { %1185 = vmatmul.mubr.bf16.gmra.mrb[40].mxu0 %v2563_v14 }
  0x77   : > { %1192 = vmatprep.mubr.bf16.mxu0 %v2567_v15 }
  0x78   : > { %1346 = vmatmul.mubr.bf16.gmra.mrb[40].mxu1 %v2566_v16 }
  0x79   : > { %1353 = vmatprep.mubr.bf16.mxu1 %v2570_v17 }
  0x7e   : > { %1193 = vmatmul.mubr.bf16.gmra.mrb[44].mxu0 %v2569_v18 }
  0x7f   : > { %1200 = vmatprep.mubr.bf16.mxu0 %v2573_v19 }
  0x80   : > { %1354 = vmatmul.mubr.bf16.gmra.mrb[44].mxu1 %v2572_v20 }
  0x81   : > { %1361 = vmatprep.mubr.bf16.mxu1 %v2577_v21 }
  0x86   : > { %1201 = vmatmul.mubr.bf16.gmra.mrb[48].mxu0 %v2575_v22 }
  0x87   : > { %1208 = vmatprep.mubr.bf16.mxu0 %v2580_v23 }
  0x88   : > { %1362 = vmatmul.mubr.bf16.gmra.mrb[48].mxu1 %v2579_v24 }
  0x89   : > { %1369 = vmatprep.mubr.bf16.mxu1 %v2583_v25 }
  0x8e   : > { %1209 = vmatmul.mubr.bf16.gmra.mrb[52].mxu0 %v2582_v27 }
  0x8f   : > { %1216 = vmatprep.mubr.bf16.mxu0 %v2586_v28 }
  0x90   : > { %1370 = vmatmul.mubr.bf16.gmra.mrb[52].mxu1 %v2585_v29 }
  0x91   : > { %1377 = vmatprep.mubr.bf16.mxu1 %v2589_v30 }
  0x96   : > { %1217 = vmatmul.mubr.bf16.gmra.mrb[56].mxu0 %v2588_v31 }
  0x97   : > { %1224 = vmatprep.mubr.bf16.mxu0 %v2592_v32 }
  0x98   : > { %1378 = vmatmul.mubr.bf16.gmra.mrb[56].mxu1 %v2591_v33 }
  0x99   : > { %1385 = vmatprep.mubr.bf16.mxu1 %v2595_v34 }
  0x9e   : > { %1225 = vmatmul.mubr.bf16.gmra.mrb[60].mxu0 %v2594_v35 }
  0x9f   : > { %2389 = vmatprep.mubr.msk.bf16.mxu0 %vm1023_vm0, %v2598_v36 }
  0xa0   : > { %1386 = vmatmul.mubr.bf16.gmra.mrb[60].mxu1 %v2597_v37 }
  0xa6   : > { %2390 = vmatmul.mubr.msk.bf16.vlgmr.msra.gmra.mrb[64].mxu0 %vm1023_vm0, %v2599_v38 }
  0xa7   : > { %2393 = vmatprep.mubr.msk.bf16.mxu0 %vm1023_vm0, %v2600_v39 }
  0xae   : > { %2394 = vmatmul.mubr.msk.bf16.gmra.mrb[68].mxu0 %vm1023_vm0, %v2601_v40 }
  0xaf   : > { %2397 = vmatprep.mubr.msk.bf16.mxu0 %vm1023_vm0, %v2602_v41 }
  0xb6   : > { %2398 = vmatmul.mubr.msk.bf16.gmra.mrb[72].mxu0 %vm1023_vm0, %v2603_v42 }
  0xb7   : > { %2401 = vmatprep.mubr.msk.bf16.mxu0 %vm1023_vm0, %v2604_v43 }
  0xbe   : > { %2402 = vmatmul.mubr.msk.bf16.gmra.mrb[76].mxu0 %vm1023_vm0, %v2605_v44 }
  0xbf   : > { %2405 = vmatprep.mubr.msk.bf16.mxu0 %vm1023_vm0, %v2606_v45 }
  0xc6   : > { %2406 = vmatmul.mubr.msk.bf16.gmra.mrb[80].mxu0 %vm1023_vm0, %v2607_v46 }
  0xc7   : > { %2409 = vmatprep.mubr.msk.bf16.mxu0 %vm1023_vm0, %v2608_v47 }
  0xce   : > { %2410 = vmatmul.mubr.msk.bf16.gmra.mrb[84].mxu0 %vm1023_vm0, %v2609_v49 }
  0xcf   : > { %2413 = vmatprep.mubr.msk.bf16.mxu0 %vm1023_vm0, %v2610_v50 }
  0xd6   : > { %2414 = vmatmul.mubr.msk.bf16.gmra.mrb[88].mxu0 %vm1023_vm0, %v2611_v51 }
  0xd7   : > { %2417 = vmatprep.mubr.msk.bf16.mxu0 %vm1023_vm0, %v2612_v52 }
  0xde   : > { %2418 = vmatmul.mubr.msk.bf16.gmra.mrb[92].mxu0 %vm1023_vm0, %v2613_v53 }
  0xf9   : > { %v2135_v54 = vpop.f32.mrb[0].mxu0 }
  0xfa   : > { %v2136_v56 = vpop.f32.mrb[1].mxu0 }
  0xfb   : > { %v2137_v57 = vadd.f32 %v2136_v56, %v2135_v54  ;;  %v2138_v58 = vpop.f32.mrb[2].mxu0  ;;  %v2247_v59 = vpop.f32.mrb[0].mxu1 }
  0xfc   : > { %v2139_v60 = vpop.f32.mrb[3].mxu0  ;;  %v2248_v63 = vpop.f32.mrb[1].mxu1 }
  0xfd   : > { %v1107_v61 = vadd.f32 %v2137_v57, %v2885_v55  ;;  %v2140_v62 = vadd.f32 %v2139_v60, %v2138_v58  ;;  %v2249_v0 = vadd.f32 %v2248_v63, %v2247_v59  ;;  %v2250_v1 = vpop.f32.mrb[2].mxu1 }
  0xfe   : > { %v2251_v3 = vpop.f32.mrb[3].mxu1 }
  0xff   : > { %v1110_v2 = vadd.f32 %v2140_v62, %v2885_v55  ;;  %v2252_v4 = vadd.f32 %v2251_v3, %v2250_v1  ;;  %v2889_v5 = vadd.f32 %v2249_v0, %v1107_v61 }
 0x101   : > { %v2141_v6 = vpop.f32.mrb[4].mxu0  ;;  %v2891_v8 = vadd.f32 %v2252_v4, %v1110_v2 }
 0x102   : > { %v2142_v7 = vpop.f32.mrb[5].mxu0 }
 0x103   : > { %v2143_v9 = vadd.f32 %v2142_v7, %v2141_v6  ;;  %v2144_v10 = vpop.f32.mrb[6].mxu0  ;;  %v2253_v11 = vpop.f32.mrb[4].mxu1 }
 0x104   : > { %v2145_v12 = vpop.f32.mrb[7].mxu0  ;;  %v2254_v15 = vpop.f32.mrb[5].mxu1 }
 0x105   : > { %v1115_v13 = vadd.f32 %v2143_v9, %v2885_v55  ;;  %v2146_v14 = vadd.f32 %v2145_v12, %v2144_v10  ;;  %v2255_v16 = vadd.f32 %v2254_v15, %v2253_v11  ;;  %v2256_v17 = vpop.f32.mrb[6].mxu1 }
 0x106   : > { %v2257_v19 = vpop.f32.mrb[7].mxu1 }
 0x107   : > { %v1118_v18 = vadd.f32 %v2146_v14, %v2885_v55  ;;  %v2258_v20 = vadd.f32 %v2257_v19, %v2256_v17  ;;  %v2895_v21 = vadd.f32 %v2255_v16, %v1115_v13 }
 0x109   : > { %v2147_v22 = vpop.f32.mrb[8].mxu0  ;;  %v2897_v24 = vadd.f32 %v2258_v20, %v1118_v18 }
 0x10a   : > { %v2148_v23 = vpop.f32.mrb[9].mxu0 }
 0x10b   : > { %v2149_v25 = vadd.f32 %v2148_v23, %v2147_v22  ;;  %v2150_v26 = vpop.f32.mrb[10].mxu0  ;;  %v2259_v27 = vpop.f32.mrb[8].mxu1 }
 0x10c   : > { %v2151_v28 = vpop.f32.mrb[11].mxu0  ;;  %v2260_v31 = vpop.f32.mrb[9].mxu1 }
 0x10d   : > { %v1123_v29 = vadd.f32 %v2149_v25, %v2885_v55  ;;  %v2152_v30 = vadd.f32 %v2151_v28, %v2150_v26  ;;  %v2261_v32 = vadd.f32 %v2260_v31, %v2259_v27  ;;  %v2262_v33 = vpop.f32.mrb[10].mxu1 }
 0x10e   : > { %v2263_v35 = vpop.f32.mrb[11].mxu1 }
 0x10f   : > { %v1126_v34 = vadd.f32 %v2152_v30, %v2885_v55  ;;  %v2264_v36 = vadd.f32 %v2263_v35, %v2262_v33  ;;  %v2901_v37 = vadd.f32 %v2261_v32, %v1123_v29 }
 0x111   : > { %v2153_v38 = vpop.f32.mrb[12].mxu0  ;;  %v2903_v40 = vadd.f32 %v2264_v36, %v1126_v34 }
 0x112   : > { %v2154_v39 = vpop.f32.mrb[13].mxu0 }
 0x113   : > { %v2155_v41 = vadd.f32 %v2154_v39, %v2153_v38  ;;  %v2156_v42 = vpop.f32.mrb[14].mxu0  ;;  %v2265_v43 = vpop.f32.mrb[12].mxu1 }
 0x114   : > { %v2157_v44 = vpop.f32.mrb[15].mxu0  ;;  %v2266_v47 = vpop.f32.mrb[13].mxu1 }
 0x115   : > { %v1131_v45 = vadd.f32 %v2155_v41, %v2885_v55  ;;  %v2158_v46 = vadd.f32 %v2157_v44, %v2156_v42  ;;  %v2267_v48 = vadd.f32 %v2266_v47, %v2265_v43  ;;  %v2268_v49 = vpop.f32.mrb[14].mxu1 }
 0x116   : > { %v2269_v51 = vpop.f32.mrb[15].mxu1 }
 0x117   : > { %v1134_v50 = vadd.f32 %v2158_v46, %v2885_v55  ;;  %v2270_v52 = vadd.f32 %v2269_v51, %v2268_v49  ;;  %v2907_v53 = vadd.f32 %v2267_v48, %v1131_v45 }
 0x119   : > { %v2159_v54 = vpop.f32.mrb[16].mxu0  ;;  %v2909_v57 = vadd.f32 %v2270_v52, %v1134_v50 }
 0x11a   : > { %v2160_v56 = vpop.f32.mrb[17].mxu0 }
 0x11b   : > { %v2161_v58 = vadd.f32 %v2160_v56, %v2159_v54  ;;  %v2162_v59 = vpop.f32.mrb[18].mxu0  ;;  %v2271_v60 = vpop.f32.mrb[16].mxu1 }
 0x11c   : > { %v2163_v61 = vpop.f32.mrb[19].mxu0  ;;  %v2272_v0 = vpop.f32.mrb[17].mxu1 }
 0x11d   : > { %v1139_v62 = vadd.f32 %v2161_v58, %v2885_v55  ;;  %v2164_v63 = vadd.f32 %v2163_v61, %v2162_v59  ;;  %v2273_v1 = vadd.f32 %v2272_v0, %v2271_v60  ;;  %v2274_v2 = vpop.f32.mrb[18].mxu1 }
 0x11e   : > { %v2275_v4 = vpop.f32.mrb[19].mxu1 }
 0x11f   : > { %v1142_v3 = vadd.f32 %v2164_v63, %v2885_v55  ;;  %v2276_v6 = vadd.f32 %v2275_v4, %v2274_v2  ;;  %v2913_v7 = vadd.f32 %v2273_v1, %v1139_v62 }
 0x121   : > { %v2165_v9 = vpop.f32.mrb[20].mxu0  ;;  %v2915_v11 = vadd.f32 %v2276_v6, %v1142_v3 }
 0x122   : > { %v2166_v10 = vpop.f32.mrb[21].mxu0 }
 0x123   : > { %v2167_v12 = vadd.f32 %v2166_v10, %v2165_v9  ;;  %v2168_v13 = vpop.f32.mrb[22].mxu0  ;;  %v2277_v14 = vpop.f32.mrb[20].mxu1 }
 0x124   : > { %v2169_v15 = vpop.f32.mrb[23].mxu0  ;;  %v2278_v18 = vpop.f32.mrb[21].mxu1 }
 0x125   : > { %v1147_v16 = vadd.f32 %v2167_v12, %v2885_v55  ;;  %v2170_v17 = vadd.f32 %v2169_v15, %v2168_v13  ;;  %v2279_v19 = vadd.f32 %v2278_v18, %v2277_v14  ;;  %v2280_v20 = vpop.f32.mrb[22].mxu1 }
 0x126   : > { %v2281_v23 = vpop.f32.mrb[23].mxu1 }
 0x127   : > { %v1150_v22 = vadd.f32 %v2170_v17, %v2885_v55  ;;  %v2282_v25 = vadd.f32 %v2281_v23, %v2280_v20  ;;  %v2919_v26 = vadd.f32 %v2279_v19, %v1147_v16 }
 0x129   : > { %v2171_v27 = vpop.f32.mrb[24].mxu0  ;;  %v2921_v29 = vadd.f32 %v2282_v25, %v1150_v22 }
 0x12a   : > { %v2172_v28 = vpop.f32.mrb[25].mxu0 }
 0x12b   : > { %v2173_v30 = vadd.f32 %v2172_v28, %v2171_v27  ;;  %v2174_v31 = vpop.f32.mrb[26].mxu0  ;;  %v2283_v32 = vpop.f32.mrb[24].mxu1 }
 0x12c   : > { %v2175_v33 = vpop.f32.mrb[27].mxu0  ;;  %v2284_v36 = vpop.f32.mrb[25].mxu1 }
 0x12d   : > { %v1155_v34 = vadd.f32 %v2173_v30, %v2885_v55  ;;  %v2176_v35 = vadd.f32 %v2175_v33, %v2174_v31  ;;  %v2285_v38 = vadd.f32 %v2284_v36, %v2283_v32  ;;  %v2286_v39 = vpop.f32.mrb[26].mxu1 }
 0x12e   : > { %v2287_v42 = vpop.f32.mrb[27].mxu1 }
 0x12f   : > { %v1158_v41 = vadd.f32 %v2176_v35, %v2885_v55  ;;  %v2288_v43 = vadd.f32 %v2287_v42, %v2286_v39  ;;  %v2925_v44 = vadd.f32 %v2285_v38, %v1155_v34 }
 0x131   : > { %v2177_v45 = vpop.f32.mrb[28].mxu0  ;;  %v2927_v47 = vadd.f32 %v2288_v43, %v1158_v41 }
 0x132   : > { %v2178_v46 = vpop.f32.mrb[29].mxu0 }
 0x133   : > { %v2179_v48 = vadd.f32 %v2178_v46, %v2177_v45  ;;  %v2180_v49 = vpop.f32.mrb[30].mxu0  ;;  %v2289_v50 = vpop.f32.mrb[28].mxu1 }
 0x134   : > { %v2181_v51 = vpop.f32.mrb[31].mxu0  ;;  %v2290_v56 = vpop.f32.mrb[29].mxu1 }
 0x135   : > { %v1163_v52 = vadd.f32 %v2179_v48, %v2885_v55  ;;  %v2182_v54 = vadd.f32 %v2181_v51, %v2180_v49  ;;  %v2291_v58 = vadd.f32 %v2290_v56, %v2289_v50  ;;  %v2292_v59 = vpop.f32.mrb[30].mxu1 }
 0x136   : > { %v2293_v61 = vpop.f32.mrb[31].mxu1 }
 0x137   : > { %v1166_v60 = vadd.f32 %v2182_v54, %v2885_v55  ;;  %v2294_v62 = vadd.f32 %v2293_v61, %v2292_v59  ;;  %v2931_v63 = vadd.f32 %v2291_v58, %v1163_v52 }
 0x139   : > { %v2183_v0 = vpop.f32.mrb[32].mxu0  ;;  %v2933_v2 = vadd.f32 %v2294_v62, %v1166_v60 }
 0x13a   : > { %v2184_v1 = vpop.f32.mrb[33].mxu0 }
 0x13b   : > { %v2185_v3 = vadd.f32 %v2184_v1, %v2183_v0  ;;  %v2186_v4 = vpop.f32.mrb[34].mxu0  ;;  %v2295_v6 = vpop.f32.mrb[32].mxu1 }
 0x13c   : > { %v2187_v9 = vpop.f32.mrb[35].mxu0  ;;  %v2296_v13 = vpop.f32.mrb[33].mxu1 }
 0x13d   : > { %v1171_v10 = vadd.f32 %v2185_v3, %v2885_v55  ;;  %v2188_v12 = vadd.f32 %v2187_v9, %v2186_v4  ;;  %v2297_v14 = vadd.f32 %v2296_v13, %v2295_v6  ;;  %v2298_v15 = vpop.f32.mrb[34].mxu1 }
 0x13e   : > { %v2299_v17 = vpop.f32.mrb[35].mxu1 }
 0x13f   : > { %v1174_v16 = vadd.f32 %v2188_v12, %v2885_v55  ;;  %v2300_v18 = vadd.f32 %v2299_v17, %v2298_v15  ;;  %v2937_v19 = vadd.f32 %v2297_v14, %v1171_v10 }
 0x141   : > { %v2189_v20 = vpop.f32.mrb[36].mxu0  ;;  %v2939_v23 = vadd.f32 %v2300_v18, %v1174_v16 }
 0x142   : > { %v2190_v22 = vpop.f32.mrb[37].mxu0 }
 0x143   : > { %v2191_v25 = vadd.f32 %v2190_v22, %v2189_v20  ;;  %v2192_v27 = vpop.f32.mrb[38].mxu0  ;;  %v2301_v28 = vpop.f32.mrb[36].mxu1 }
 0x144   : > { %v2193_v30 = vpop.f32.mrb[39].mxu0  ;;  %v2302_v33 = vpop.f32.mrb[37].mxu1 }
 0x145   : > { %v1179_v31 = vadd.f32 %v2191_v25, %v2885_v55  ;;  %v2194_v32 = vadd.f32 %v2193_v30, %v2192_v27  ;;  %v2303_v34 = vadd.f32 %v2302_v33, %v2301_v28  ;;  %v2304_v35 = vpop.f32.mrb[38].mxu1 }
 0x146   : > { %v2305_v38 = vpop.f32.mrb[39].mxu1 }
 0x147   : > { %v1182_v36 = vadd.f32 %v2194_v32, %v2885_v55  ;;  %v2306_v39 = vadd.f32 %v2305_v38, %v2304_v35  ;;  %v2943_v41 = vadd.f32 %v2303_v34, %v1179_v31 }
 0x149   : > { %v2195_v42 = vpop.f32.mrb[40].mxu0  ;;  %v2945_v45 = vadd.f32 %v2306_v39, %v1182_v36 }
 0x14a   : > { %v2196_v43 = vpop.f32.mrb[41].mxu0 }
 0x14b   : > { %v2197_v46 = vadd.f32 %v2196_v43, %v2195_v42  ;;  %v2198_v48 = vpop.f32.mrb[42].mxu0  ;;  %v2307_v49 = vpop.f32.mrb[40].mxu1 }
 0x14c   : > { %v2199_v50 = vpop.f32.mrb[43].mxu0  ;;  %v2308_v54 = vpop.f32.mrb[41].mxu1 }
 0x14d   : > { %v1187_v51 = vadd.f32 %v2197_v46, %v2885_v55  ;;  %v2200_v52 = vadd.f32 %v2199_v50, %v2198_v48  ;;  %v2309_v56 = vadd.f32 %v2308_v54, %v2307_v49  ;;  %v2310_v58 = vpop.f32.mrb[42].mxu1 }
 0x14e   : > { %v2311_v60 = vpop.f32.mrb[43].mxu1 }
 0x14f   : > { %v1190_v59 = vadd.f32 %v2200_v52, %v2885_v55  ;;  %v2312_v61 = vadd.f32 %v2311_v60, %v2310_v58  ;;  %v2949_v62 = vadd.f32 %v2309_v56, %v1187_v51 }
 0x151   : > { %v2201_v0 = vpop.f32.mrb[44].mxu0  ;;  %v2951_v3 = vadd.f32 %v2312_v61, %v1190_v59 }
 0x152   : > { %v2202_v1 = vpop.f32.mrb[45].mxu0 }
 0x153   : > { %v2203_v4 = vadd.f32 %v2202_v1, %v2201_v0  ;;  %v2204_v6 = vpop.f32.mrb[46].mxu0  ;;  %v2313_v9 = vpop.f32.mrb[44].mxu1 }
 0x154   : > { %v2205_v10 = vpop.f32.mrb[47].mxu0  ;;  %v2314_v14 = vpop.f32.mrb[45].mxu1 }
 0x155   : > { %v1195_v12 = vadd.f32 %v2203_v4, %v2885_v55  ;;  %v2206_v13 = vadd.f32 %v2205_v10, %v2204_v6  ;;  %v2315_v15 = vadd.f32 %v2314_v14, %v2313_v9  ;;  %v2316_v16 = vpop.f32.mrb[46].mxu1 }
 0x156   : > { %v2317_v18 = vpop.f32.mrb[47].mxu1 }
 0x157   : > { %v1198_v17 = vadd.f32 %v2206_v13, %v2885_v55  ;;  %v2318_v20 = vadd.f32 %v2317_v18, %v2316_v16  ;;  %v2955_v22 = vadd.f32 %v2315_v15, %v1195_v12 }
 0x159   : > { %v2207_v25 = vpop.f32.mrb[48].mxu0  ;;  %v2957_v28 = vadd.f32 %v2318_v20, %v1198_v17 }
 0x15a   : > { %v2208_v27 = vpop.f32.mrb[49].mxu0 }
 0x15b   : > { %v2209_v30 = vadd.f32 %v2208_v27, %v2207_v25  ;;  %v2210_v31 = vpop.f32.mrb[50].mxu0  ;;  %v2319_v32 = vpop.f32.mrb[48].mxu1 }
 0x15c   : > { %v2211_v33 = vpop.f32.mrb[51].mxu0  ;;  %v2320_v36 = vpop.f32.mrb[49].mxu1 }
 0x15d   : > { %v1203_v34 = vadd.f32 %v2209_v30, %v2885_v55  ;;  %v2212_v35 = vadd.f32 %v2211_v33, %v2210_v31  ;;  %v2321_v38 = vadd.f32 %v2320_v36, %v2319_v32  ;;  %v2322_v39 = vpop.f32.mrb[50].mxu1 }
 0x15e   : > { %v2323_v43 = vpop.f32.mrb[51].mxu1 }
 0x15f   : > { %v1206_v42 = vadd.f32 %v2212_v35, %v2885_v55  ;;  %v2324_v46 = vadd.f32 %v2323_v43, %v2322_v39  ;;  %v2961_v48 = vadd.f32 %v2321_v38, %v1203_v34 }
 0x161   : > { %v2213_v49 = vpop.f32.mrb[52].mxu0  ;;  %v2963_v51 = vadd.f32 %v2324_v46, %v1206_v42 }
 0x162   : > { %v2214_v50 = vpop.f32.mrb[53].mxu0 }
 0x163   : > { %v2215_v52 = vadd.f32 %v2214_v50, %v2213_v49  ;;  %v2216_v54 = vpop.f32.mrb[54].mxu0  ;;  %v2325_v56 = vpop.f32.mrb[52].mxu1 }
 0x164   : > { %v2217_v58 = vpop.f32.mrb[55].mxu0  ;;  %v2326_v61 = vpop.f32.mrb[53].mxu1 }
 0x165   : > { %v1211_v59 = vadd.f32 %v2215_v52, %v2885_v55  ;;  %v2218_v60 = vadd.f32 %v2217_v58, %v2216_v54  ;;  %v2327_v0 = vadd.f32 %v2326_v61, %v2325_v56  ;;  %v2328_v1 = vpop.f32.mrb[54].mxu1 }
 0x166   : > { %v2329_v6 = vpop.f32.mrb[55].mxu1 }
 0x167   : > { %v1214_v4 = vadd.f32 %v2218_v60, %v2885_v55  ;;  %v2330_v9 = vadd.f32 %v2329_v6, %v2328_v1  ;;  %v2967_v10 = vadd.f32 %v2327_v0, %v1211_v59 }
 0x169   : > { %v2219_v12 = vpop.f32.mrb[56].mxu0  ;;  %v2969_v14 = vadd.f32 %v2330_v9, %v1214_v4 }
 0x16a   : > { %v2220_v13 = vpop.f32.mrb[57].mxu0 }
 0x16b   : > { %v2221_v15 = vadd.f32 %v2220_v13, %v2219_v12  ;;  %v2222_v16 = vpop.f32.mrb[58].mxu0  ;;  %v2331_v17 = vpop.f32.mrb[56].mxu1 }
 0x16c   : > { %v2223_v18 = vpop.f32.mrb[59].mxu0  ;;  %v2332_v27 = vpop.f32.mrb[57].mxu1 }
 0x16d   : > { %v1219_v20 = vadd.f32 %v2221_v15, %v2885_v55  ;;  %v2224_v25 = vadd.f32 %v2223_v18, %v2222_v16  ;;  %v2333_v30 = vadd.f32 %v2332_v27, %v2331_v17  ;;  %v2334_v31 = vpop.f32.mrb[58].mxu1 }
 0x16e   : > { %v2335_v33 = vpop.f32.mrb[59].mxu1 }
 0x16f   : > { %v1222_v32 = vadd.f32 %v2224_v25, %v2885_v55  ;;  %v2336_v34 = vadd.f32 %v2335_v33, %v2334_v31  ;;  %v2973_v35 = vadd.f32 %v2333_v30, %v1219_v20 }
 0x171   : > { %v2225_v36 = vpop.f32.mrb[60].mxu0  ;;  %v2975_v39 = vadd.f32 %v2336_v34, %v1222_v32 }
 0x172   : > { %v2226_v38 = vpop.f32.mrb[61].mxu0 }
 0x173   : > { %v2227_v42 = vadd.f32 %v2226_v38, %v2225_v36  ;;  %v2228_v43 = vpop.f32.mrb[62].mxu0  ;;  %v2337_v46 = vpop.f32.mrb[60].mxu1 }
 0x174   : > { %v2229_v49 = vpop.f32.mrb[63].mxu0  ;;  %v2338_v54 = vpop.f32.mrb[61].mxu1 }
 0x175   : > { %v1227_v50 = vadd.f32 %v2227_v42, %v2885_v55  ;;  %v2230_v52 = vadd.f32 %v2229_v49, %v2228_v43  ;;  %v2339_v56 = vadd.f32 %v2338_v54, %v2337_v46  ;;  %v2340_v58 = vpop.f32.mrb[62].mxu1 }
 0x176   : > { %v2341_v60 = vpop.f32.mrb[63].mxu1 }
 0x177   : > { %v1230_v59 = vadd.f32 %v2230_v52, %v2885_v55  ;;  %v2342_v61 = vadd.f32 %v2341_v60, %v2340_v58  ;;  %v2979_v0 = vadd.f32 %v2339_v56, %v1227_v50 }
 0x179   : > { %v2391_v1 = vpop.f32.mrb[64].mxu0  ;;  %v2982_v9 = vadd.f32 %v2342_v61, %v1230_v59 }
 0x17a   : > { %v1437_v4 = vadd.f32 %v2391_v1, %v2895_v21  ;;  %v1428_v6 = vpop.f32.mrb[65].mxu0 }
 0x17b   : > { %v1429_v12 = vadd.f32 %v1428_v6, %v2889_v5  ;;  %v2392_v13 = vpop.f32.mrb[66].mxu0 }
 0x17c   : > { %v1440_v15 = vadd.f32 %v2392_v13, %v2897_v24  ;;  %v1431_v16 = vpop.f32.mrb[67].mxu0  ;;  %v1557_v18 = vmax.f32 %v1437_v4, 0.0 }
 0x17d   : > { %v1432_v17 = vadd.f32 %v1431_v16, %v2891_v8  ;;  %v1555_v20 = vmax.f32 %v1429_v12, 0.0 }
 0x17e   : > { %v1558_v55 = vmax.f32 %v1440_v15, 0.0 }
 0x17f   : > { %v1556_v25 = vmax.f32 %v1432_v17, 0.0 }
 0x180   : > { %v1588_v27 = vpack.c.bf16 %v1558_v55, %v1557_v18 }
 0x181   : > { %v1587_v30 = vpack.c.bf16 %v1556_v25, %v1555_v20  ;;  %v2395_v31 = vpop.f32.mrb[68].mxu0 }
 0x182   : > { %v1453_v21 = vadd.f32 %v2395_v31, %v2907_v53  ;;  %v1444_v32 = vpop.f32.mrb[69].mxu0 }
 0x183   : > { %v1445_v33 = vadd.f32 %v1444_v32, %v2901_v37  ;;  %v2396_v5 = vpop.f32.mrb[70].mxu0  ;;  %2425 = vmatprep.mubr.msk.bf16.mxu1 %vm1626_vm1, %v1587_v30 }
 0x184   : > { %v1456_v24 = vadd.f32 %v2396_v5, %v2909_v57  ;;  %v1447_v34 = vpop.f32.mrb[71].mxu0  ;;  %2426 = vmatmul.mubr.msk.bf16.vlgmr.msra.gmra.mrb[64].mxu1 %vm1626_vm1, %v1588_v27  ;;  %v1561_v36 = vmax.f32 %v1453_v21, 0.0 }
 0x185   : > { %v1448_v8 = vadd.f32 %v1447_v34, %v2903_v40  ;;  %v1559_v42 = vmax.f32 %v1445_v33, 0.0 }
 0x186   : > { %v1562_v38 = vmax.f32 %v1456_v24, 0.0 }
 0x187   : > { %v1560_v43 = vmax.f32 %v1448_v8, 0.0 }
 0x188   : > { %v1590_v46 = vpack.c.bf16 %v1562_v38, %v1561_v36 }
 0x189   : > { %v1589_v49 = vpack.c.bf16 %v1560_v43, %v1559_v42  ;;  %v2399_v53 = vpop.f32.mrb[72].mxu0 }
 0x18a   : > { %v1469_v50 = vadd.f32 %v2399_v53, %v2919_v26  ;;  %v1460_v37 = vpop.f32.mrb[73].mxu0 }
 0x18b   : > { %v1461_v52 = vadd.f32 %v1460_v37, %v2913_v7  ;;  %v2400_v54 = vpop.f32.mrb[74].mxu0  ;;  %2429 = vmatprep.mubr.msk.bf16.mxu1 %vm1626_vm1, %v1589_v49 }
 0x18c   : > { %v1472_v57 = vadd.f32 %v2400_v54, %v2921_v29  ;;  %v1463_v56 = vpop.f32.mrb[75].mxu0  ;;  %2430 = vmatmul.mubr.msk.bf16.gmra.mrb[68].mxu1 %vm1626_vm1, %v1590_v46  ;;  %v1565_v58 = vmax.f32 %v1469_v50, 0.0 }
 0x18d   : > { %v1464_v40 = vadd.f32 %v1463_v56, %v2915_v11  ;;  %v1563_v60 = vmax.f32 %v1461_v52, 0.0 }
 0x18e   : > { %v1566_v59 = vmax.f32 %v1472_v57, 0.0 }
 0x18f   : > { %v1564_v61 = vmax.f32 %v1464_v40, 0.0 }
 0x190   : > { %v1592_v1 = vpack.c.bf16 %v1566_v59, %v1565_v58 }
 0x191   : > { %v1591_v4 = vpack.c.bf16 %v1564_v61, %v1563_v60  ;;  %v2403_v26 = vpop.f32.mrb[76].mxu0 }
 0x192   : > { %v1485_v6 = vadd.f32 %v2403_v26, %v2931_v63  ;;  %v1476_v7 = vpop.f32.mrb[77].mxu0 }
 0x193   : > { %v1477_v12 = vadd.f32 %v1476_v7, %v2925_v44  ;;  %v2404_v13 = vpop.f32.mrb[78].mxu0  ;;  %2433 = vmatprep.mubr.msk.bf16.mxu1 %vm1626_vm1, %v1591_v4 }
 0x194   : > { %v1488_v29 = vadd.f32 %v2404_v13, %v2933_v2  ;;  %v1479_v15 = vpop.f32.mrb[79].mxu0  ;;  %2434 = vmatmul.mubr.msk.bf16.gmra.mrb[72].mxu1 %vm1626_vm1, %v1592_v1  ;;  %v1569_v16 = vmax.f32 %v1485_v6, 0.0 }
 0x195   : > { %v1480_v11 = vadd.f32 %v1479_v15, %v2927_v47  ;;  %v1567_v18 = vmax.f32 %v1477_v12, 0.0 }
 0x196   : > { %v1570_v17 = vmax.f32 %v1488_v29, 0.0 }
 0x197   : > { %v1568_v55 = vmax.f32 %v1480_v11, 0.0 }
 0x198   : > { %v1594_v20 = vpack.c.bf16 %v1570_v17, %v1569_v16 }
 0x199   : > { %v1593_v25 = vpack.c.bf16 %v1568_v55, %v1567_v18  ;;  %v2407_v63 = vpop.f32.mrb[80].mxu0 }
 0x19a   : > { %v1501_v27 = vadd.f32 %v2407_v63, %v2943_v41  ;;  %v1492_v44 = vpop.f32.mrb[81].mxu0 }
 0x19b   : > { %v1493_v30 = vadd.f32 %v1492_v44, %v2937_v19  ;;  %v2408_v31 = vpop.f32.mrb[82].mxu0  ;;  %2437 = vmatprep.mubr.msk.bf16.mxu1 %vm1626_vm1, %v1593_v25 }
 0x19c   : > { %v1504_v2 = vadd.f32 %v2408_v31, %v2945_v45  ;;  %v1495_v21 = vpop.f32.mrb[83].mxu0  ;;  %2438 = vmatmul.mubr.msk.bf16.gmra.mrb[76].mxu1 %vm1626_vm1, %v1594_v20  ;;  %v1573_v32 = vmax.f32 %v1501_v27, 0.0 }
 0x19d   : > { %v1496_v47 = vadd.f32 %v1495_v21, %v2939_v23  ;;  %v1571_v5 = vmax.f32 %v1493_v30, 0.0 }
 0x19e   : > { %v1574_v33 = vmax.f32 %v1504_v2, 0.0 }
 0x19f   : > { %v1572_v24 = vmax.f32 %v1496_v47, 0.0 }
 0x1a0   : > { %v1596_v34 = vpack.c.bf16 %v1574_v33, %v1573_v32 }
 0x1a1   : > { %v1595_v8 = vpack.c.bf16 %v1572_v24, %v1571_v5  ;;  %v2411_v41 = vpop.f32.mrb[84].mxu0 }
 0x1a2   : > { %v1517_v36 = vadd.f32 %v2411_v41, %v2955_v22  ;;  %v1508_v19 = vpop.f32.mrb[85].mxu0 }
 0x1a3   : > { %v1509_v38 = vadd.f32 %v1508_v19, %v2949_v62  ;;  %v2412_v42 = vpop.f32.mrb[86].mxu0  ;;  %2441 = vmatprep.mubr.msk.bf16.mxu1 %vm1626_vm1, %v1595_v8 }
 0x1a4   : > { %v1520_v45 = vadd.f32 %v2412_v42, %v2957_v28  ;;  %v1511_v43 = vpop.f32.mrb[87].mxu0  ;;  %2442 = vmatmul.mubr.msk.bf16.gmra.mrb[80].mxu1 %vm1626_vm1, %v1596_v34  ;;  %v1577_v46 = vmax.f32 %v1517_v36, 0.0 }
 0x1a5   : > { %v1512_v23 = vadd.f32 %v1511_v43, %v2951_v3  ;;  %v1575_v53 = vmax.f32 %v1509_v38, 0.0 }
 0x1a6   : > { %v1578_v49 = vmax.f32 %v1520_v45, 0.0 }
 0x1a7   : > { %v1576_v50 = vmax.f32 %v1512_v23, 0.0 }
 0x1a8   : > { %v1598_v37 = vpack.c.bf16 %v1578_v49, %v1577_v46 }
 0x1a9   : > { %v1597_v52 = vpack.c.bf16 %v1576_v50, %v1575_v53  ;;  %v2415_v22 = vpop.f32.mrb[88].mxu0 }
 0x1aa   : > { %v1533_v54 = vadd.f32 %v2415_v22, %v2967_v10  ;;  %v1524_v62 = vpop.f32.mrb[89].mxu0 }
 0x1ab   : > { %v1525_v57 = vadd.f32 %v1524_v62, %v2961_v48  ;;  %v2416_v56 = vpop.f32.mrb[90].mxu0  ;;  %2445 = vmatprep.mubr.msk.bf16.mxu1 %vm1626_vm1, %v1597_v52 }
 0x1ac   : > { %v1536_v28 = vadd.f32 %v2416_v56, %v2969_v14  ;;  %v1527_v40 = vpop.f32.mrb[91].mxu0  ;;  %2446 = vmatmul.mubr.msk.bf16.gmra.mrb[84].mxu1 %vm1626_vm1, %v1598_v37  ;;  %v1581_v58 = vmax.f32 %v1533_v54, 0.0 }
 0x1ad   : > { %v1528_v3 = vadd.f32 %v1527_v40, %v2963_v51  ;;  %v1579_v60 = vmax.f32 %v1525_v57, 0.0 }
 0x1ae   : > { %v1582_v59 = vmax.f32 %v1536_v28, 0.0 }
 0x1af   : > { %v1580_v61 = vmax.f32 %v1528_v3, 0.0 }
 0x1b0   : > { %v1600_v1 = vpack.c.bf16 %v1582_v59, %v1581_v58 }
 0x1b1   : > { %v1599_v4 = vpack.c.bf16 %v1580_v61, %v1579_v60  ;;  %v2419_v10 = vpop.f32.mrb[92].mxu0 }
 0x1b2   : > { %v1549_v26 = vadd.f32 %v2419_v10, %v2979_v0  ;;  %v1540_v48 = vpop.f32.mrb[93].mxu0 }
 0x1b3   : > { %v1541_v6 = vadd.f32 %v1540_v48, %v2973_v35  ;;  %v2420_v7 = vpop.f32.mrb[94].mxu0  ;;  %2449 = vmatprep.mubr.msk.bf16.mxu1 %vm1626_vm1, %v1599_v4  ;;  %v3034_v35 = vld [vmem:[%s3113_s4] ss:$0 sm:$0xff] }
 0x1b4   : > { %v1552_v14 = vadd.f32 %v2420_v7, %v2982_v9  ;;  %v1543_v12 = vpop.f32.mrb[95].mxu0  ;;  %2450 = vmatmul.mubr.msk.bf16.gmra.mrb[88].mxu1 %vm1626_vm1, %v1600_v1  ;;  %v1585_v13 = vmax.f32 %v1549_v26, 0.0 }
 0x1b5   : > { %v1544_v51 = vadd.f32 %v1543_v12, %v2975_v39  ;;  %v1583_v15 = vmax.f32 %v1541_v6, 0.0 }
 0x1b6   : > { %v1586_v29 = vmax.f32 %v1552_v14, 0.0 }
 0x1b7   : > { %v1584_v11 = vmax.f32 %v1544_v51, 0.0 }
 0x1b8   : > { %v1602_v16 = vpack.c.bf16 %v1586_v29, %v1585_v13 }
 0x1b9   : > { %v1601_v0 = vpack.c.bf16 %v1584_v11, %v1583_v15 }
 0x1bb   : > { %2453 = vmatprep.mubr.msk.bf16.mxu1 %vm1626_vm1, %v1601_v0 }
 0x1bc   : > { %2454 = vmatmul.mubr.msk.bf16.gmra.mrb[92].mxu1 %vm1626_vm1, %v1602_v16 }
 0x257   : > { %v2427_v9 = vpop.f32.mrb[64].mxu1 }
 0x258   : > { %v1718_v17 = vadd.f32 %v2427_v9, %v3034_v35  ;;  %v1709_v39 = vpop.f32.mrb[65].mxu1 }
 0x259   : > { %v1710_v18 = vadd.f32 %v3034_v35, %v1709_v39  ;;  %v2428_v55 = vpop.f32.mrb[66].mxu1 }
 0x25a   : > { %v1838_v20 = vmax.f32 %v1718_v17, 0.0  ;;  %v1721_v25 = vadd.f32 %v2428_v55, %v3034_v35  ;;  %v1712_v63 = vpop.f32.mrb[67].mxu1 }
 0x25b   : > { %v1836_v27 = vmax.f32 %v1710_v18, 0.0  ;;  %v1713_v44 = vadd.f32 %v3034_v35, %v1712_v63 }
 0x25c   : > { %1870 = vst [vmem:[%s3041_s13 + $0x10] sm:$0xff] %v1838_v20  ;;  %v1839_v30 = vmax.f32 %v1721_v25, 0.0 }
 0x25d   : > { %1868 = vst [vmem:[%s3041_s13] sm:$0xff] %v1836_v27  ;;  %v1837_v31 = vmax.f32 %v1713_v44, 0.0 }
 0x25e   : > { %1871 = vst [vmem:[%s3041_s13 + $0x18] sm:$0xff] %v1839_v30 }
 0x25f   : > { %1869 = vst [vmem:[%s3041_s13 + $0x8] sm:$0xff] %v1837_v31  ;;  %v2431_v2 = vpop.f32.mrb[68].mxu1 }
 0x260   : > { %v1734_v21 = vadd.f32 %v2431_v2, %v3034_v35  ;;  %v1725_v47 = vpop.f32.mrb[69].mxu1 }
 0x261   : > { %v1726_v32 = vadd.f32 %v3034_v35, %v1725_v47  ;;  %v2432_v33 = vpop.f32.mrb[70].mxu1 }
 0x262   : > { %v1842_v5 = vmax.f32 %v1734_v21, 0.0  ;;  %v1737_v24 = vadd.f32 %v2432_v33, %v3034_v35  ;;  %v1728_v34 = vpop.f32.mrb[71].mxu1 }
 0x263   : > { %v1840_v8 = vmax.f32 %v1726_v32, 0.0  ;;  %v1729_v41 = vadd.f32 %v3034_v35, %v1728_v34 }
 0x264   : > { %1874 = vst [vmem:[%s3041_s13 + $0x30] sm:$0xff] %v1842_v5  ;;  %v1843_v36 = vmax.f32 %v1737_v24, 0.0 }
 0x265   : > { %1872 = vst [vmem:[%s3041_s13 + $0x20] sm:$0xff] %v1840_v8  ;;  %v1841_v19 = vmax.f32 %v1729_v41, 0.0 }
 0x266   : > { %1875 = vst [vmem:[%s3041_s13 + $0x38] sm:$0xff] %v1843_v36 }
 0x267   : > { %1873 = vst [vmem:[%s3041_s13 + $0x28] sm:$0xff] %v1841_v19  ;;  %v2435_v38 = vpop.f32.mrb[72].mxu1 }
 0x268   : > { %v1750_v42 = vadd.f32 %v2435_v38, %v3034_v35  ;;  %v1741_v45 = vpop.f32.mrb[73].mxu1 }
 0x269   : > { %v1742_v43 = vadd.f32 %v3034_v35, %v1741_v45  ;;  %v2436_v23 = vpop.f32.mrb[74].mxu1 }
 0x26a   : > { %v1846_v46 = vmax.f32 %v1750_v42, 0.0  ;;  %v1753_v49 = vadd.f32 %v2436_v23, %v3034_v35  ;;  %v1744_v53 = vpop.f32.mrb[75].mxu1 }
 0x26b   : > { %v1844_v50 = vmax.f32 %v1742_v43, 0.0  ;;  %v1745_v37 = vadd.f32 %v3034_v35, %v1744_v53 }
 0x26c   : > { %1878 = vst [vmem:[%s3041_s13 + $0x50] sm:$0xff] %v1846_v46  ;;  %v1847_v52 = vmax.f32 %v1753_v49, 0.0 }
 0x26d   : > { %1876 = vst [vmem:[%s3041_s13 + $0x40] sm:$0xff] %v1844_v50  ;;  %v1845_v22 = vmax.f32 %v1745_v37, 0.0 }
 0x26e   : > { %1879 = vst [vmem:[%s3041_s13 + $0x58] sm:$0xff] %v1847_v52 }
 0x26f   : > { %1877 = vst [vmem:[%s3041_s13 + $0x48] sm:$0xff] %v1845_v22  ;;  %v2439_v54 = vpop.f32.mrb[76].mxu1 }
 0x270   : > { %v1766_v62 = vadd.f32 %v2439_v54, %v3034_v35  ;;  %v1757_v57 = vpop.f32.mrb[77].mxu1 }
 0x271   : > { %v1758_v56 = vadd.f32 %v3034_v35, %v1757_v57  ;;  %v2440_v28 = vpop.f32.mrb[78].mxu1 }
 0x272   : > { %v1850_v40 = vmax.f32 %v1766_v62, 0.0  ;;  %v1769_v3 = vadd.f32 %v2440_v28, %v3034_v35  ;;  %v1760_v58 = vpop.f32.mrb[79].mxu1 }
 0x273   : > { %v1848_v59 = vmax.f32 %v1758_v56, 0.0  ;;  %v1761_v60 = vadd.f32 %v3034_v35, %v1760_v58 }
 0x274   : > { %1882 = vst [vmem:[%s3041_s13 + $0x70] sm:$0xff] %v1850_v40  ;;  %v1851_v61 = vmax.f32 %v1769_v3, 0.0 }
 0x275   : > { %1880 = vst [vmem:[%s3041_s13 + $0x60] sm:$0xff] %v1848_v59  ;;  %v1849_v1 = vmax.f32 %v1761_v60, 0.0 }
 0x276   : > { %1883 = vst [vmem:[%s3041_s13 + $0x78] sm:$0xff] %v1851_v61 }
 0x277   : > { %1881 = vst [vmem:[%s3041_s13 + $0x68] sm:$0xff] %v1849_v1  ;;  %v2443_v4 = vpop.f32.mrb[80].mxu1 }
 0x278   : > { %v1782_v10 = vadd.f32 %v2443_v4, %v3034_v35  ;;  %v1773_v26 = vpop.f32.mrb[81].mxu1 }
 0x279   : > { %v1774_v48 = vadd.f32 %v3034_v35, %v1773_v26  ;;  %v2444_v6 = vpop.f32.mrb[82].mxu1 }
 0x27a   : > { %v1854_v7 = vmax.f32 %v1782_v10, 0.0  ;;  %v1785_v14 = vadd.f32 %v2444_v6, %v3034_v35  ;;  %v1776_v12 = vpop.f32.mrb[83].mxu1 }
 0x27b   : > { %v1852_v51 = vmax.f32 %v1774_v48, 0.0  ;;  %v1777_v13 = vadd.f32 %v3034_v35, %v1776_v12 }
 0x27c   : > { %1886 = vst [vmem:[%s3041_s13 + $0x90] sm:$0xff] %v1854_v7  ;;  %v1855_v29 = vmax.f32 %v1785_v14, 0.0 }
 0x27d   : > { %1884 = vst [vmem:[%s3041_s13 + $0x80] sm:$0xff] %v1852_v51  ;;  %v1853_v15 = vmax.f32 %v1777_v13, 0.0 }
 0x27e   : > { %1887 = vst [vmem:[%s3041_s13 + $0x98] sm:$0xff] %v1855_v29 }
 0x27f   : > { %1885 = vst [vmem:[%s3041_s13 + $0x88] sm:$0xff] %v1853_v15  ;;  %v2447_v11 = vpop.f32.mrb[84].mxu1 }
 0x280   : > { %v1798_v16 = vadd.f32 %v2447_v11, %v3034_v35  ;;  %v1789_v0 = vpop.f32.mrb[85].mxu1 }
 0x281   : > { %v1790_v9 = vadd.f32 %v3034_v35, %v1789_v0  ;;  %v2448_v17 = vpop.f32.mrb[86].mxu1 }
 0x282   : > { %v1858_v39 = vmax.f32 %v1798_v16, 0.0  ;;  %v1801_v18 = vadd.f32 %v2448_v17, %v3034_v35  ;;  %v1792_v55 = vpop.f32.mrb[87].mxu1 }
 0x283   : > { %v1856_v20 = vmax.f32 %v1790_v9, 0.0  ;;  %v1793_v25 = vadd.f32 %v3034_v35, %v1792_v55 }
 0x284   : > { %1890 = vst [vmem:[%s3041_s13 + $0xb0] sm:$0xff] %v1858_v39  ;;  %v1859_v63 = vmax.f32 %v1801_v18, 0.0 }
 0x285   : > { %1888 = vst [vmem:[%s3041_s13 + $0xa0] sm:$0xff] %v1856_v20  ;;  %v1857_v27 = vmax.f32 %v1793_v25, 0.0 }
 0x286   : > { %1891 = vst [vmem:[%s3041_s13 + $0xb8] sm:$0xff] %v1859_v63 }
 0x287   : > { %1889 = vst [vmem:[%s3041_s13 + $0xa8] sm:$0xff] %v1857_v27  ;;  %v2451_v44 = vpop.f32.mrb[88].mxu1 }
 0x288   : > { %v1814_v30 = vadd.f32 %v2451_v44, %v3034_v35  ;;  %v1805_v31 = vpop.f32.mrb[89].mxu1 }
 0x289   : > { %v1806_v2 = vadd.f32 %v3034_v35, %v1805_v31  ;;  %v2452_v21 = vpop.f32.mrb[90].mxu1 }
 0x28a   : > { %v1862_v47 = vmax.f32 %v1814_v30, 0.0  ;;  %v1817_v32 = vadd.f32 %v2452_v21, %v3034_v35  ;;  %v1808_v33 = vpop.f32.mrb[91].mxu1 }
 0x28b   : > { %v1860_v5 = vmax.f32 %v1806_v2, 0.0  ;;  %v1809_v24 = vadd.f32 %v3034_v35, %v1808_v33 }
 0x28c   : > { %1894 = vst [vmem:[%s3041_s13 + $0xd0] sm:$0xff] %v1862_v47  ;;  %v1863_v34 = vmax.f32 %v1817_v32, 0.0 }
 0x28d   : > { %1892 = vst [vmem:[%s3041_s13 + $0xc0] sm:$0xff] %v1860_v5  ;;  %v1861_v8 = vmax.f32 %v1809_v24, 0.0 }
 0x28e   : > { %1895 = vst [vmem:[%s3041_s13 + $0xd8] sm:$0xff] %v1863_v34 }
 0x28f   : > { %1893 = vst [vmem:[%s3041_s13 + $0xc8] sm:$0xff] %v1861_v8  ;;  %v2455_v41 = vpop.f32.mrb[92].mxu1 }
 0x290   : > { %v1830_v36 = vadd.f32 %v2455_v41, %v3034_v35  ;;  %v1821_v19 = vpop.f32.mrb[93].mxu1 }
 0x291   : > { %v1822_v38 = vadd.f32 %v3034_v35, %v1821_v19  ;;  %v2456_v42 = vpop.f32.mrb[94].mxu1 }
 0x292   : > { %v1866_v45 = vmax.f32 %v1830_v36, 0.0  ;;  %v1833_v43 = vadd.f32 %v2456_v42, %v3034_v35  ;;  %v1824_v23 = vpop.f32.mrb[95].mxu1 }
 0x293   : > { %v1864_v46 = vmax.f32 %v1822_v38, 0.0  ;;  %v1825_v49 = vadd.f32 %v3034_v35, %v1824_v23 }
 0x294   : > { %1898 = vst [vmem:[%s3041_s13 + $0xf0] sm:$0xff] %v1866_v45  ;;  %v1867_v53 = vmax.f32 %v1833_v43, 0.0 }
 0x295   : > { %1896 = vst [vmem:[%s3041_s13 + $0xe0] sm:$0xff] %v1864_v46  ;;  %v1865_v50 = vmax.f32 %v1825_v49, 0.0 }
 0x296   : > { %1899 = vst [vmem:[%s3041_s13 + $0xf8] sm:$0xff] %v1867_v53 }
 0x297   : > { %1897 = vst [vmem:[%s3041_s13 + $0xe8] sm:$0xff] %v1865_v50 }
 0x298 PF: > { %s15_s18 = sadd.s32 1, %s2622_s18  }
 0x299   : > { %p12_p4 = scmp.ge.s32.totalorder %s15_s18, 4  }
 0x29b   :  { %14 = sbr.rel (!%p12_p4) target bundleno = 1 (0x1), region = 70 }

</bundles_post_ra>
